<compile_context>
chip_gen: v5e
topology: v5e:2x2
jax: 0.10.0
libtpu: 0.0.40
codegen_flags: <defaults>
</compile_context>

<pallas_src>
import math
from functools import partial

import jax
import jax.numpy as jnp
from jax.experimental import pallas as pl
from jax.experimental.pallas import tpu as pltpu


# ----------------------------------------------------------------------------
# Kernels
# ----------------------------------------------------------------------------
def _fused_kernel(x_ref, w_ref, b_ref, o_ref, *, apply_relu):
    # x_ref: (tm, N*F_in), w_ref: (N*F_in, N*F_out) block-diagonal (resident),
    # b_ref: (1, N*F_out) (resident), o_ref: (tm, N*F_out).  f32 accumulation.
    y = jnp.dot(x_ref[...], w_ref[...], preferred_element_type=jnp.float32)
    y = y + b_ref[...].astype(jnp.float32)           # (1, NF) broadcasts over rows
    if apply_relu:
        y = jnp.maximum(y, 0.0)
    o_ref[...] = y.astype(o_ref.dtype)


def _grouped_kernel(x_ref, w_ref, b_ref, o_ref, *, apply_relu):
    # Instance-major fallback.  x_ref: (1, tm, F_in), w_ref: (1, F_in, F_out),
    # b_ref: (1, 1, F_out), o_ref: (1, tm, F_out).
    y = jnp.dot(x_ref[0], w_ref[0], preferred_element_type=jnp.float32)
    y = y + b_ref[0].astype(jnp.float32)              # (1, F_out) broadcasts
    if apply_relu:
        y = jnp.maximum(y, 0.0)
    o_ref[0] = y.astype(o_ref.dtype)


# ----------------------------------------------------------------------------
# Host-side helpers
# ----------------------------------------------------------------------------
def _cdiv(a, b):
    return -(-a // b)


def _round_up(x, m):
    return _cdiv(x, m) * m


def _vmem_capacity_bytes():
    try:
        cap = int(pltpu.get_tpu_info().vmem_capacity_bytes)
        if cap > 0:
            return cap
    except Exception:
        pass
    return 64 << 20  # conservative fallback (v7x per-TC VMEM)


def _vmem_limit_bytes():
    # ~48 MiB on v7x (64 MiB VMEM), ~96 MiB on v5e/v6e (128 MiB VMEM).
    return int(min(_vmem_capacity_bytes() * 3 // 4, 100 << 20))


def _choose_tm(m, row_in_bytes, row_out_bytes, budget_bytes, *,
               tm_cap=8192, target_step_bytes=16 << 20):
    """Rows per grid step.  Multiple of 8; double-buffered x+out tiles fit
    `budget_bytes`; aims at ~target_step_bytes of HBM traffic per step to
    amortize the ~0.35us fixed per-step overhead while leaving several steps
    for pipeline overlap / v7x megacore sharding at large M.  No padding:
    the last block simply overhangs (OOB writes dropped)."""
    stream = max(1, row_in_bytes + row_out_bytes)      # HBM bytes per row / step
    fit = (budget_bytes // (2 * stream)) // 8 * 8      # 2x: double-buffered
    target = (target_step_bytes // stream) // 8 * 8
    tm = max(8, min(tm_cap, fit, max(512, target)))
    tm = min(tm, _round_up(m, 8))
    return max(8, tm)


def pack_block_diagonal(weight):
    """[N, F_in, F_out] -> block-diagonal [N*F_in, N*F_out].
    Hoist/cache this (or pass it to multi_dense via `packed_weight=`) when
    weights are static across calls to avoid rebuilding it every forward."""
    n, f_in, f_out = weight.shape
    eye = jnp.eye(n, dtype=weight.dtype)
    return jnp.einsum("nm,ncf->ncmf", eye, weight).reshape(n * f_in, n * f_out)


# ----------------------------------------------------------------------------
# Fused path: one lane-dense MXU matmul per M tile (block-diagonal weight).
# ----------------------------------------------------------------------------
def _multi_dense_fused(x2, weight, bias, n, f_in, f_out, *, apply_relu,
                       vmem_limit, tile_budget, packed_weight=None):
    m = x2.shape[0]
    nk, nf = n * f_in, n * f_out
    isz = jnp.dtype(x2.dtype).itemsize

    tm = _choose_tm(m, nk * isz, nf * isz, tile_budget)
    n_tiles = _cdiv(m, tm)

    if packed_weight is None:
        packed_weight = pack_block_diagonal(weight)    # (nk, nf)
    b_row = bias.reshape(1, nf)

    cost = pl.CostEstimate(
        flops=2 * m * nk * nf,                          # actual block-diag MXU work
        transcendentals=0,
        bytes_accessed=(m * nk + nk * nf + nf + m * nf) * isz,
    )

    return pl.pallas_call(
        partial(_fused_kernel, apply_relu=apply_relu),
        out_shape=jax.ShapeDtypeStruct((m, nf), x2.dtype),   # exact shape, no pad
        grid_spec=pltpu.PrefetchScalarGridSpec(
            num_scalar_prefetch=0,
            grid=(n_tiles,),
            in_specs=[
                pl.BlockSpec((tm, nk), lambda i: (i, 0)),
                # Constant index_map -> DMA'd once, resident across all M tiles.
                pl.BlockSpec((nk, nf), lambda i: (0, 0)),
                pl.BlockSpec((1, nf), lambda i: (0, 0)),
            ],
            out_specs=pl.BlockSpec((tm, nf), lambda i: (i, 0)),
        ),
        compiler_params=pltpu.CompilerParams(
            # v7x megacore shards this "parallel" axis across its 2 TCs; if a
            # Mosaic dump shows it isn't split, escalate to pltpu.CORE_PARALLEL.
            dimension_semantics=("parallel",),
            vmem_limit_bytes=vmem_limit,
        ),
        cost_estimate=cost,
    )(x2, packed_weight, b_row)


# ----------------------------------------------------------------------------
# Grouped fallback (large N*F): instance-major, lane-dense blocks, weight
# resident per instance across M tiles.
# ----------------------------------------------------------------------------
def _multi_dense_grouped(x3, weight, bias, n, f_in, f_out, *, apply_relu,
                         vmem_limit):
    m = x3.shape[0]
    isz = jnp.dtype(x3.dtype).itemsize
    w_isz = jnp.dtype(weight.dtype).itemsize

    headroom = 4 << 20
    resident = 2 * (f_in * f_out + f_out) * w_isz       # double-buffered w + b
    tile_budget = max(1 << 20, vmem_limit - resident - headroom)
    tm = _choose_tm(m, f_in * isz, f_out * isz, tile_budget)
    m_tiles = _cdiv(m, tm)

    # Instance-major layout -> contiguous (tm, F) DMA blocks and full sublane
    # utilization.  One extra HBM pass each for x and out (the transposes);
    # still far cheaper than (tm, 1, F) strided DMAs / masked stores.
    xt = jnp.transpose(x3, (1, 0, 2))                    # [N, M, F_in]
    b3 = bias.reshape(n, 1, f_out)

    cost = pl.CostEstimate(
        flops=2 * m * n * f_in * f_out,
        transcendentals=0,
        bytes_accessed=(m * n * f_in + n * f_in * f_out + n * f_out
                        + m * n * f_out) * isz,
    )

    out = pl.pallas_call(
        partial(_grouped_kernel, apply_relu=apply_relu),
        out_shape=jax.ShapeDtypeStruct((n, m, f_out), x3.dtype),
        grid_spec=pltpu.PrefetchScalarGridSpec(
            num_scalar_prefetch=0,
            # Inner axis = M tiles -> weight/bias block index is constant along
            # it, so each instance's weight is DMA'd once and stays resident.
            grid=(n, m_tiles),
            in_specs=[
                pl.BlockSpec((1, tm, f_in), lambda i, j: (i, j, 0)),
                pl.BlockSpec((1, f_in, f_out), lambda i, j: (i, 0, 0)),
                pl.BlockSpec((1, 1, f_out), lambda i, j: (i, 0, 0)),
            ],
            out_specs=pl.BlockSpec((1, tm, f_out), lambda i, j: (i, j, 0)),
        ),
        compiler_params=pltpu.CompilerParams(
            dimension_semantics=("parallel", "parallel"),
            vmem_limit_bytes=vmem_limit,
        ),
        cost_estimate=cost,
    )(xt, weight, b3)

    return jnp.transpose(out, (1, 0, 2))                 # back to [M, N, F_out]


# ----------------------------------------------------------------------------
# Public wrapper
# ----------------------------------------------------------------------------
def multi_dense(x, weight, bias=None, *, activation="relu",
                max_fused_weight_bytes=None,
                max_fused_flops_per_byte=512.0,
                packed_weight=None):
    """MultiDense forward.

    x: [..., N, F_in], weight: [N, F_in, F_out], bias: [N, F_out] or None.
    Returns act(einsum('...nc,ncf->...nf', x, weight) + bias) in x.dtype.
    Accumulation is always f32; pass bf16 x/weights to halve HBM traffic.
    """
    *lead, n, f_in = x.shape
    n_w, f_in_w, f_out = weight.shape
    assert n == n_w and f_in == f_in_w
    if bias is None:
        bias = jnp.zeros((n, f_out), dtype=weight.dtype)
    assert bias.shape == (n, f_out)

    act = (activation or "linear").lower()
    assert act in ("relu", "linear"), f"unsupported activation: {activation}"
    apply_relu = act == "relu"

    m = int(math.prod(lead)) if lead else 1
    nk, nf = n * f_in, n * f_out
    x_isz = jnp.dtype(x.dtype).itemsize
    w_isz = jnp.dtype(weight.dtype).itemsize

    vmem_limit = _vmem_limit_bytes()
    if max_fused_weight_bytes is None:
        max_fused_weight_bytes = vmem_limit // 6

    headroom = 4 << 20
    resident_fused = 2 * (nk * nf + nf) * w_isz          # default double-buffer
    tile_budget_fused = vmem_limit - resident_fused - headroom
    # Block-diag matmul does N x the useful FLOPs; keep its intensity well under
    # the MXU roofline so the fused path stays HBM-bound on all generations.
    bd_intensity = 2.0 * nk * nf / max(1, (nk + nf) * x_isz)
    use_fused = (
        nk * nf * w_isz <= max_fused_weight_bytes
        and bd_intensity <= max_fused_flops_per_byte
        and tile_budget_fused >= 8 * 2 * (nk + nf) * x_isz
    )

    if use_fused:
        if packed_weight is not None:
            assert packed_weight.shape == (nk, nf)
        # [..., N, F_in] -> [M, N*F_in] is a free, contiguous reshape.
        out2 = _multi_dense_fused(
            x.reshape(m, nk), weight, bias, n, f_in, f_out,
            apply_relu=apply_relu, vmem_limit=vmem_limit,
            tile_budget=tile_budget_fused, packed_weight=packed_weight)
        return out2.reshape(*lead, n, f_out)

    out3 = _multi_dense_grouped(
        x.reshape(m, n, f_in), weight, bias, n, f_in, f_out,
        apply_relu=apply_relu, vmem_limit=vmem_limit)
    return out3.reshape(*lead, n, f_out)


if __name__ == "__main__":
    # Small shapes consistent with the module docstring layout [b t n f].
    B, T, N, F_IN, F_OUT = 2, 8, 4, 16, 32

    key = jax.random.PRNGKey(0)
    kx, kw, kb = jax.random.split(key, 3)

    x = jax.random.normal(kx, (B, T, N, F_IN), dtype=jnp.float32)

    # reset_parameters(): uniform(-1/sqrt(in_channels), +1/sqrt(in_channels))
    bound = 1.0 / math.sqrt(F_IN)
    weight = jax.random.uniform(kw, (N, F_IN, F_OUT), jnp.float32,
                                minval=-bound, maxval=bound)
    bias = jax.random.uniform(kb, (N, F_OUT), jnp.float32,
                              minval=-bound, maxval=bound)

    # Pure-JAX reference: einsum '...xy,xyz->...xz' + bias + ReLU.
    ref = jnp.maximum(jnp.einsum("btnc,ncf->btnf", x, weight)
                      + bias[None, None, :, :], 0.0)

    # 1) Primary fused (block-diagonal, lane-dense) path, f32.
    out = jax.block_until_ready(multi_dense(x, weight, bias))
    assert out.shape == (B, T, N, F_OUT)
    assert jnp.allclose(out, ref, atol=1e-5, rtol=1e-5)

    # 2) Instance-major fallback path (forced by zero fused budget).
    out2 = jax.block_until_ready(
        multi_dense(x, weight, bias, max_fused_weight_bytes=0))
    assert jnp.allclose(out2, ref, atol=1e-5, rtol=1e-5)

    # 3) bf16 inputs (halved HBM traffic); f32 accumulation, looser tolerance.
    out3 = jax.block_until_ready(
        multi_dense(x.astype(jnp.bfloat16), weight.astype(jnp.bfloat16),
                    bias.astype(jnp.bfloat16)))
    assert out3.dtype == jnp.bfloat16
    assert jnp.allclose(out3.astype(jnp.float32), ref, atol=5e-2, rtol=5e-2)

    print("KERNEL_OK")
</pallas_src>

<mosaic_0001>
module attributes {stable_mosaic.version = 11 : i64} {
  func.func @_fused_kernel(%arg0: i32, %arg1: memref<16x64xf32, #tpu.memory_space<vmem>>, %arg2: memref<64x128xf32, #tpu.memory_space<vmem>>, %arg3: memref<1x128xf32, #tpu.memory_space<vmem>>, %arg4: memref<16x128xf32, #tpu.memory_space<vmem>>) attributes {dimension_semantics = [#tpu.dimension_semantics<parallel>], iteration_bounds = array<i64: 1>, scalar_prefetch = 0 : i64, scratch_operands = 0 : i64, tpu.core_type = #tpu.core_type<tc>, window_params = [{transform_indices = @transform_0, window_bounds = array<i64: 16, 64>}, {pipeline_mode = #tpu.pipeline_mode<synchronous>, transform_indices = @transform_1, window_bounds = array<i64: 64, 128>}, {pipeline_mode = #tpu.pipeline_mode<synchronous>, transform_indices = @transform_2, window_bounds = array<i64: 1, 128>}, {transform_indices = @transform_3, window_bounds = array<i64: 16, 128>}]} {
    %c0 = arith.constant 0 : index
    %c0_0 = arith.constant 0 : index
    %0 = vector.load %arg1[%c0, %c0_0] : memref<16x64xf32, #tpu.memory_space<vmem>>, vector<16x64xf32>
    %c0_1 = arith.constant 0 : index
    %c0_2 = arith.constant 0 : index
    %1 = vector.load %arg2[%c0_1, %c0_2] : memref<64x128xf32, #tpu.memory_space<vmem>>, vector<64x128xf32>
    %cst = arith.constant dense<0.000000e+00> : vector<16x128xf32>
    %2 = tpu.matmul %0, %1, %cst {dimension_numbers = #tpu.dot_dimension_numbers<[1], [0], [0], [1], [0, 0, 1, 1], [], []>} : vector<16x64xf32>, vector<64x128xf32>, vector<16x128xf32> -> vector<16x128xf32>
    %c0_3 = arith.constant 0 : index
    %c0_4 = arith.constant 0 : index
    %3 = vector.load %arg3[%c0_3, %c0_4] : memref<1x128xf32, #tpu.memory_space<vmem>>, vector<1x128xf32>
    %4 = vector.broadcast %3 : vector<1x128xf32> to vector<16x128xf32>
    %5 = arith.addf %2, %4 : vector<16x128xf32>
    %cst_5 = arith.constant 0.000000e+00 : f32
    %6 = vector.broadcast %cst_5 : f32 to vector<16x128xf32>
    %7 = arith.maximumf %5, %6 : vector<16x128xf32>
    %c0_6 = arith.constant 0 : index
    %c0_7 = arith.constant 0 : index
    %8 = vector.load %arg4[%c0_6, %c0_7] : memref<16x128xf32, #tpu.memory_space<vmem>>, vector<16x128xf32>
    tpu.vector_store %arg4[%c0_6, %c0_7], %7 {strides = array<i32>} : memref<16x128xf32, #tpu.memory_space<vmem>>, vector<16x128xf32>,
    return
  }
  func.func @transform_0(%arg0: i32) -> (i32, i32) {
    %c0_i32 = arith.constant 0 : i32
    %c0_i32_0 = arith.constant 0 : i32
    return %arg0, %c0_i32 : i32, i32
  }
  func.func @transform_1(%arg0: i32) -> (i32, i32) {
    %c0_i32 = arith.constant 0 : i32
    %c0_i32_0 = arith.constant 0 : i32
    %c0_i32_1 = arith.constant 0 : i32
    return %c0_i32, %c0_i32_0 : i32, i32
  }
  func.func @transform_2(%arg0: i32) -> (i32, i32) {
    %c0_i32 = arith.constant 0 : i32
    %c0_i32_0 = arith.constant 0 : i32
    %c0_i32_1 = arith.constant 0 : i32
    return %c0_i32, %c0_i32_0 : i32, i32
  }
  func.func @transform_3(%arg0: i32) -> (i32, i32) {
    %c0_i32 = arith.constant 0 : i32
    %c0_i32_0 = arith.constant 0 : i32
    return %arg0, %c0_i32 : i32, i32
  }
}

</mosaic_0001>

<bundles_post_ra>
// kernel: tpu_custom_call.1
= control target key start
LH: loop header
LB: loop body
LE: loop exit
PB: predicated region body
PF: predicated region fallthrough
CT: control target
= control target key end

     0   :  { %8 = vsyncpa [#allocation3], 0  ;;  %s255_s0 = inlined_call_operand.hbm [shape: f32[16,64], index: 0, kind: input, shape index: {}]   ;;  %s256_s1 = inlined_call_operand.hbm [shape: f32[64,128], index: 1, kind: input, shape index: {}]   ;;  %s257_s2 = inlined_call_operand.vmem [shape: f32[1,128], index: 2, kind: input, shape index: {}]   ;;  %s258_s3 = inlined_call_operand.hbm [shape: f32[16,128], index: 3, kind: output, shape index: {}]  }
   0x1   :  { %9 = vsyncpa [#allocation6], 0 }
   0x2   :  { %10 = vsyncpa [#allocation4], 0  ;;  %s15_s14 = sshll.u32 %s255_s0, 4  ;;  %s209_s15 = smov [#allocation2]   ;;  %s16_s14 = int_to_ptr.hbm [resolvable:$true] %s15_s14 }
   0x3   :  { %s17_s16 = sshll.u32 %s209_s15, 4  ;;  %s28_s19 = sshll.u32 %s256_s1, 4  ;;  %s18_s16 = int_to_ptr.vmem [resolvable:$true] %s17_s16  ;;  %s29_s19 = int_to_ptr.hbm [resolvable:$true] %s28_s19 }
   0x4   :  { %s210_s20 = smov 128   ;;  %s211_s21 = smov 8  }
   0x5   :  { %23 = dma.hbm_to_vmem [thread:$0]  %s16_s14, 256, %s18_s16, [#allocation3], %s210_s20, %s210_s20, %s211_s21  }
   0x6   :  { %s212_s22 = smov [#allocation5]  }
   0x7   :  { %s30_s23 = sshll.u32 %s212_s22, 4  ;;  %s31_s23 = int_to_ptr.vmem [resolvable:$true] %s30_s23 }
   0x8   :  { %36 = dma.hbm_to_vmem [thread:$0]  %s29_s19, 1024, %s31_s23, [#allocation6], %s210_s20, %s210_s20, %s211_s21  }
   0x9   :  { %203 = dma.done.wait [#allocation3], 256  }
   0xa   :  { %204 = vsyncadd [#allocation3], 4294967040 }
   0xb   :  { %205 = dma.done.wait [#allocation6], 1024  }
   0xc   :  { %206 = vsyncadd [#allocation6], 4294966272  ;;  %v56_v0 = vld [vmem:[#allocation5 + $0x38] sm:$0xff]  ;;  %v55_v1 = vld [vmem:[#allocation5 + $0x30] sm:$0xff]  ;;  %vm61_vm0 = vcmask 523264   ;;  %s213_s24 = smov [#allocation7]  }
   0xd   :  { %76 = vmatpush.msra.mxu0 %v56_v0  ;;  %117 = vmatpush.msra.mxu1 %v56_v0  ;;  %v54_v2 = vld [vmem:[#allocation5 + $0x28] sm:$0xff]  ;;  %v53_v3 = vld [vmem:[#allocation5 + $0x20] sm:$0xff]  ;;  %v52_v4 = vld [vmem:[#allocation5 + $0x18] sm:$0xff]  ;;  %s99_s25 = sshll.u32 %s213_s24, 4  ;;  %s101_s28 = sshll.u32 %s258_s3, 4  ;;  %s100_s25 = int_to_ptr.vmem [resolvable:$true] %s99_s25  ;;  %s102_s28 = int_to_ptr.hbm [resolvable:$true] %s101_s28 }
   0xe   :  { %v51_v5 = vld [vmem:[#allocation5 + $0x10] sm:$0xff]  ;;  %v50_v6 = vld [vmem:[#allocation5 + $0x8] sm:$0xff]  ;;  %v49_v7 = vld [vmem:[#allocation5] sm:$0xff] }
   0xf   :  { %77 = vmatpush.msra.mxu0 %v55_v1  ;;  %118 = vmatpush.msra.mxu1 %v55_v1  ;;  %v47_v8 = vld [vmem:[#allocation2] sm:$0xff]  ;;  %v48_v9 = vld [vmem:[#allocation2 + $0x8] sm:$0xff] }
  0x10   :  { %v130_v10 = vld [vmem:[%s257_s2] ss:$0 sm:$0xff] }
  0x11   :  { %78 = vmatpush.msra.mxu0 %v54_v2  ;;  %119 = vmatpush.msra.mxu1 %v54_v2 }
  0x13   :  { %79 = vmatpush.msra.mxu0 %v53_v3  ;;  %120 = vmatpush.msra.mxu1 %v53_v3 }
  0x15   :  { %80 = vmatpush.msra.mxu0 %v52_v4  ;;  %121 = vmatpush.msra.mxu1 %v52_v4 }
  0x17   :  { %81 = vmatpush.msra.mxu0 %v51_v5  ;;  %122 = vmatpush.msra.mxu1 %v51_v5 }
  0x19   :  { %82 = vmatpush.msra.mxu0 %v50_v6  ;;  %123 = vmatpush.msra.mxu1 %v50_v6 }
  0x1b   :  { %83 = vmatpush.msra.mxu0 %v49_v7  ;;  %124 = vmatpush.msra.mxu1 %v49_v7 }
  0x1c   :  { %115 = vmatmul.msk.f32.vlgmr.msra.gmra.mxu0 %vm61_vm0, %v47_v8  ;;  %116 = vmatmul.msk.f32.vlgmr.msra.gmra.mxu1 %vm61_vm0, %v48_v9 }
  0x99   :  { %v85_v11 = vpop.f32.mrf.mxu0  ;;  %v88_v12 = vpop.f32.mrf.mxu1 }
  0x9a   :  { %v86_v13 = vadd.f32 %v130_v10, %v85_v11  ;;  %v89_v14 = vadd.f32 %v130_v10, %v88_v12 }
  0x9c   :  { %v91_v15 = vmax.f32 %v86_v13, 0.0  ;;  %v92_v16 = vmax.f32 %v89_v14, 0.0 }
  0x9e   :  { %93 = vst [vmem:[#allocation7] sm:$0xff] %v91_v15 }
  0x9f   :  { %94 = vst [vmem:[#allocation7 + $0x8] sm:$0xff] %v92_v16 }
  0xa0   :  { %107 = dma.vmem_to_hbm [thread:$0]  %s100_s25, 256, %s102_s28, [#allocation4], %s210_s20, %s210_s20, %s211_s21  }
  0xa1   :  { %207 = dma.done.wait [#allocation4], 256  }
  0xa2   :  { %208 = vsyncadd [#allocation4], 4294967040 }
  0xa3   :  { %112 = vsyncpa [#allocation3], 1 }
  0xa4   :  { %113 = vsyncpa [#allocation6], 1 }
  0xa5   :  { %114 = vsyncpa [#allocation4], 1 }

</bundles_post_ra>
